<compile_context>
chip_gen: v5e
topology: v5e:2x2
jax: 0.10.0
libtpu: 0.0.40
codegen_flags: <defaults>
</compile_context>

<pallas_src>
import functools
import math

import jax
import jax.numpy as jnp
import numpy as np
from jax.experimental import pallas as pl
from jax.experimental.pallas import tpu as pltpu

KSIZE = 3
PAD = 1  # padding=1 for kernel_size=3 (module default)


def _sa_kernel(w_ref, x_ref, o_ref, *, height, width):
    # w_ref : SMEM (2*K*K + 1,) f32 -> conv weight flattened (c, ky, kx), then bias
    # x_ref : VMEM (NB, C, H*W)   lane-dense slab (native dtype)
    # o_ref : VMEM (NB, C, H*W)
    x = x_ref[...]
    nb, c_dim, hw = x.shape

    # Channel pools (reduce over C).  Mean accumulates in f32; max is computed
    # in the native dtype and only the small (NB, HW) result is cast.
    avg = jnp.sum(x, axis=1, dtype=jnp.float32) * (1.0 / c_dim)   # (NB, HW) f32
    mx = jnp.max(x, axis=1).astype(jnp.float32)                   # (NB, HW) f32

    # Hoist all SMEM scalar reads out of the unrolled tap loop.
    w = [w_ref[i] for i in range(2 * KSIZE * KSIZE)]
    bias = w_ref[2 * KSIZE * KSIZE]

    # Flat-index / column maps and boundary masks (built once, AND-ed per tap).
    idx = jax.lax.broadcasted_iota(jnp.int32, (nb, hw), 1)
    if width & (width - 1) == 0:                     # power-of-two fast path
        col = jnp.bitwise_and(idx, width - 1)
    else:
        col = idx % width
    row_masks, col_masks = {}, {}
    for d in range(-PAD, PAD + 1):
        if d < 0:
            row_masks[d] = idx >= (-d) * width       # source row >= -d
            col_masks[d] = col >= -d
        elif d > 0:
            row_masks[d] = idx < (height - d) * width  # source row < H - d
            col_masks[d] = col < (width - d)
        else:
            row_masks[d] = None
            col_masks[d] = None

    # 2-in-channel 3x3 conv on the pooled maps, fully unrolled as 9 taps in the
    # flattened H*W space.  Per tap: weight the pair (VPU), ONE roll (XLU),
    # mask the zero-padding region, accumulate.
    acc = None
    for ky in range(KSIZE):
        dy = ky - PAD
        for kx in range(KSIZE):
            dx = kx - PAD
            w_a = w[0 * KSIZE * KSIZE + ky * KSIZE + kx]
            w_m = w[1 * KSIZE * KSIZE + ky * KSIZE + kx]
            comb = w_a * avg + w_m * mx              # scalar weights commute with roll
            offset = dy * width + dx                 # flat source offset
            shift = (-offset) % hw                   # jnp.roll-style shift
            term = pltpu.roll(comb, shift=shift, axis=1) if shift else comb
            mask = row_masks[dy]
            cm = col_masks[dx]
            if mask is None:
                mask = cm
            elif cm is not None:
                mask = mask & cm
            if mask is not None:
                term = jnp.where(mask, term, 0.0)
            acc = term if acc is None else acc + term

    att = jax.nn.sigmoid(acc + bias)                 # (NB, HW) attention map, f32
    # Final apply in the native dtype (no full-block f32 temporary held live).
    o_ref[...] = x_ref[...] * att[:, None, :].astype(o_ref.dtype)


def _tpu_budget():
    """(max_block_bytes, want_multi_step, vmem_limit_bytes or None) per TPU gen."""
    vmem_cap = None
    try:
        vmem_cap = int(pltpu.get_tpu_info().vmem_capacity_bytes)
    except Exception:
        vmem_cap = None
    kind = ""
    try:
        kind = jax.devices()[0].device_kind.lower()
    except Exception:
        pass

    is_v5e = ("v5e" in kind) or ("v5 lite" in kind) or ("v5lite" in kind)
    is_v6 = "v6" in kind
    is_v7 = ("7x" in kind) or ("v7" in kind) or (
        vmem_cap is not None and vmem_cap <= (96 << 20))

    if is_v5e:
        # 16 MiB default scoped VMEM: double-buffered in+out must stay inside it.
        return 2 << 20, False, None
    if is_v6:
        # Single TensorCore, 128 MiB physical (32 MiB default scoped): take the
        # largest fitting block and raise the scoped limit.
        return 8 << 20, False, 48 << 20
    if is_v7:
        # 2 TensorCores, 64 MiB physical VMEM per TC, 3.2 TB/s HBM: 8 MiB blocks
        # (4 pipeline buffers = 32 MiB) and keep >=2 grid steps for megacore.
        return 8 << 20, True, 48 << 20
    # Unknown generation: conservative defaults that fit every chip's scoped limit.
    return 2 << 20, False, None


def _pick_block_batch(n, per_image_bytes, max_block_bytes, want_multi_step,
                      min_block_bytes=256 << 10):
    """Images per grid step: biggest blocks that fit the per-step VMEM budget."""
    divisors = [d for d in range(1, n + 1) if n % d == 0]
    fitting = [d for d in divisors if d * per_image_bytes <= max_block_bytes]
    if not fitting:
        # TODO(synk): single image exceeds the VMEM block budget; tile H into row
        # blocks with a 1-row halo (or two-pass pool+apply) for very large C*H*W.
        return 1
    if want_multi_step:
        multi = [d for d in fitting
                 if n // d >= 2 and d * per_image_bytes >= min_block_bytes]
        if multi:
            return max(multi)
    return max(fitting)


def sa_forward(x, weight, bias):
    """x: (N, C, H, W); weight: (1, 2, 3, 3) f32; bias: (1,) f32."""
    N, C, H, W = x.shape
    HW = H * W
    # Lane-dense view: contiguous (free) reshape so the minor dim is H*W.
    # (For best store throughput HW should be a multiple of 128; 16x16 -> 256.)
    x2 = x.reshape(N, C, HW)
    wflat = jnp.concatenate(
        [weight.reshape(-1), bias.reshape(-1)]).astype(jnp.float32)

    max_block_bytes, want_multi, vmem_limit = _tpu_budget()
    per_image_bytes = C * HW * x.dtype.itemsize
    nb = _pick_block_batch(N, per_image_bytes, max_block_bytes, want_multi)
    grid = (N // nb,)

    cp_kwargs = dict(dimension_semantics=("parallel",))
    if vmem_limit is not None:
        cp_kwargs["vmem_limit_bytes"] = int(vmem_limit)

    kernel = functools.partial(_sa_kernel, height=H, width=W)
    out2 = pl.pallas_call(
        kernel,
        out_shape=jax.ShapeDtypeStruct((N, C, HW), x.dtype),
        grid=grid,
        in_specs=[
            pl.BlockSpec(memory_space=pltpu.MemorySpace.SMEM),   # conv weights+bias
            pl.BlockSpec((nb, C, HW), lambda n: (n, 0, 0)),      # x slab
        ],
        out_specs=pl.BlockSpec((nb, C, HW), lambda n: (n, 0, 0)),
        compiler_params=pltpu.CompilerParams(**cp_kwargs),
    )(wflat, x2)
    return out2.reshape(N, C, H, W)


def sa_reference(x, weight, bias):
    avg = jnp.mean(x, axis=1, keepdims=True)
    mx = jnp.max(x, axis=1, keepdims=True)
    cat = jnp.concatenate([avg, mx], axis=1)
    conv = jax.lax.conv_general_dilated(
        cat, weight, window_strides=(1, 1), padding=((PAD, PAD), (PAD, PAD)),
        dimension_numbers=("NCHW", "OIHW", "NCHW"))
    conv = conv + bias.reshape(1, 1, 1, 1)
    return x * jax.nn.sigmoid(conv)


if __name__ == "__main__":
    key = jax.random.PRNGKey(0)
    kx, kw, kb = jax.random.split(key, 3)

    N, C, H, W = 2, 4, 16, 16
    x = jax.random.normal(kx, (N, C, H, W), dtype=jnp.float32)

    # Deterministic init mimicking nn.Conv2d defaults (uniform +-1/sqrt(fan_in)).
    fan_in = 2 * KSIZE * KSIZE
    bound = 1.0 / math.sqrt(fan_in)
    weight = jax.random.uniform(
        kw, (1, 2, KSIZE, KSIZE), dtype=jnp.float32, minval=-bound, maxval=bound)
    bias = jax.random.uniform(
        kb, (1,), dtype=jnp.float32, minval=-bound, maxval=bound)

    out = sa_forward(x, weight, bias)
    out = jax.block_until_ready(out)

    ref = sa_reference(x, weight, bias)
    np.testing.assert_allclose(np.asarray(out), np.asarray(ref),
                               rtol=1e-5, atol=1e-5)
    print("KERNEL_OK")
</pallas_src>

<mosaic_0001>
module attributes {stable_mosaic.version = 11 : i64} {
  func.func @_sa_kernel(%arg0: i32, %arg1: memref<19xf32, #tpu.memory_space<smem>>, %arg2: memref<2x4x256xf32, #tpu.memory_space<vmem>>, %arg3: memref<2x4x256xf32, #tpu.memory_space<vmem>>) attributes {dimension_semantics = [#tpu.dimension_semantics<parallel>], iteration_bounds = array<i64: 1>, scalar_prefetch = 0 : i64, scratch_operands = 0 : i64, tpu.core_type = #tpu.core_type<tc>, window_params = [{transform_indices = @transform_0, window_bounds = array<i64: 19>}, {transform_indices = @transform_1, window_bounds = array<i64: 2, 4, 256>}, {transform_indices = @transform_2, window_bounds = array<i64: 2, 4, 256>}]} {
    %c0 = arith.constant 0 : index
    %c0_0 = arith.constant 0 : index
    %c0_1 = arith.constant 0 : index
    %0 = vector.load %arg2[%c0, %c0_0, %c0_1] : memref<2x4x256xf32, #tpu.memory_space<vmem>>, vector<2x4x256xf32>
    %cst = arith.constant dense<0.000000e+00> : vector<2x256xf32>
    %1 = vector.multi_reduction <add>, %0, %cst [1] : vector<2x4x256xf32> to vector<2x256xf32>
    %cst_2 = arith.constant 2.500000e-01 : f32
    %2 = vector.broadcast %cst_2 : f32 to vector<2x256xf32>
    %3 = arith.mulf %1, %2 : vector<2x256xf32>
    %cst_3 = arith.constant dense<0xFF800000> : vector<2x256xf32>
    %4 = vector.multi_reduction <maximumf>, %0, %cst_3 [1] : vector<2x4x256xf32> to vector<2x256xf32>
    %c0_4 = arith.constant 0 : index
    %5 = memref.load %arg1[%c0_4] : memref<19xf32, #tpu.memory_space<smem>>
    %c1 = arith.constant 1 : index
    %6 = memref.load %arg1[%c1] : memref<19xf32, #tpu.memory_space<smem>>
    %c2 = arith.constant 2 : index
    %7 = memref.load %arg1[%c2] : memref<19xf32, #tpu.memory_space<smem>>
    %c3 = arith.constant 3 : index
    %8 = memref.load %arg1[%c3] : memref<19xf32, #tpu.memory_space<smem>>
    %c4 = arith.constant 4 : index
    %9 = memref.load %arg1[%c4] : memref<19xf32, #tpu.memory_space<smem>>
    %c5 = arith.constant 5 : index
    %10 = memref.load %arg1[%c5] : memref<19xf32, #tpu.memory_space<smem>>
    %c6 = arith.constant 6 : index
    %11 = memref.load %arg1[%c6] : memref<19xf32, #tpu.memory_space<smem>>
    %c7 = arith.constant 7 : index
    %12 = memref.load %arg1[%c7] : memref<19xf32, #tpu.memory_space<smem>>
    %c8 = arith.constant 8 : index
    %13 = memref.load %arg1[%c8] : memref<19xf32, #tpu.memory_space<smem>>
    %c9 = arith.constant 9 : index
    %14 = memref.load %arg1[%c9] : memref<19xf32, #tpu.memory_space<smem>>
    %c10 = arith.constant 10 : index
    %15 = memref.load %arg1[%c10] : memref<19xf32, #tpu.memory_space<smem>>
    %c11 = arith.constant 11 : index
    %16 = memref.load %arg1[%c11] : memref<19xf32, #tpu.memory_space<smem>>
    %c12 = arith.constant 12 : index
    %17 = memref.load %arg1[%c12] : memref<19xf32, #tpu.memory_space<smem>>
    %c13 = arith.constant 13 : index
    %18 = memref.load %arg1[%c13] : memref<19xf32, #tpu.memory_space<smem>>
    %c14 = arith.constant 14 : index
    %19 = memref.load %arg1[%c14] : memref<19xf32, #tpu.memory_space<smem>>
    %c15 = arith.constant 15 : index
    %20 = memref.load %arg1[%c15] : memref<19xf32, #tpu.memory_space<smem>>
    %c16 = arith.constant 16 : index
    %21 = memref.load %arg1[%c16] : memref<19xf32, #tpu.memory_space<smem>>
    %c17 = arith.constant 17 : index
    %22 = memref.load %arg1[%c17] : memref<19xf32, #tpu.memory_space<smem>>
    %c18 = arith.constant 18 : index
    %23 = memref.load %arg1[%c18] : memref<19xf32, #tpu.memory_space<smem>>
    %24 = tpu.iota {dimensions = array<i32: 1>} : vector<2x256xi32>
    %c15_i32 = arith.constant 15 : i32
    %25 = vector.broadcast %c15_i32 : i32 to vector<2x256xi32>
    %26 = arith.andi %24, %25 : vector<2x256xi32>
    %c16_i32 = arith.constant 16 : i32
    %27 = vector.broadcast %c16_i32 : i32 to vector<2x256xi32>
    %28 = arith.cmpi sge, %24, %27 : vector<2x256xi32>
    %c1_i32 = arith.constant 1 : i32
    %29 = vector.broadcast %c1_i32 : i32 to vector<2x256xi32>
    %30 = arith.cmpi sge, %26, %29 : vector<2x256xi32>
    %c240_i32 = arith.constant 240 : i32
    %31 = vector.broadcast %c240_i32 : i32 to vector<2x256xi32>
    %32 = arith.cmpi slt, %24, %31 : vector<2x256xi32>
    %c15_i32_5 = arith.constant 15 : i32
    %33 = vector.broadcast %c15_i32_5 : i32 to vector<2x256xi32>
    %34 = arith.cmpi slt, %26, %33 : vector<2x256xi32>
    %35 = vector.broadcast %5 : f32 to vector<2x256xf32>
    %36 = arith.mulf %35, %3 : vector<2x256xf32>
    %37 = vector.broadcast %14 : f32 to vector<2x256xf32>
    %38 = arith.mulf %37, %4 : vector<2x256xf32>
    %39 = arith.addf %36, %38 : vector<2x256xf32>
    %c17_i32 = arith.constant 17 : i32
    %40 = tpu.dynamic_rotate %39 by %c17_i32 dim 1 : vector<2x256xf32>, i32 -> vector<2x256xf32>
    %41 = arith.andi %28, %30 : vector<2x256xi1>
    %cst_6 = arith.constant 0.000000e+00 : f32
    %42 = vector.broadcast %cst_6 : f32 to vector<2x256xf32>
    %43 = arith.select %41, %40, %42 : vector<2x256xi1>, vector<2x256xf32>
    %44 = vector.broadcast %6 : f32 to vector<2x256xf32>
    %45 = arith.mulf %44, %3 : vector<2x256xf32>
    %46 = vector.broadcast %15 : f32 to vector<2x256xf32>
    %47 = arith.mulf %46, %4 : vector<2x256xf32>
    %48 = arith.addf %45, %47 : vector<2x256xf32>
    %c16_i32_7 = arith.constant 16 : i32
    %49 = tpu.dynamic_rotate %48 by %c16_i32_7 dim 1 : vector<2x256xf32>, i32 -> vector<2x256xf32>
    %cst_8 = arith.constant 0.000000e+00 : f32
    %50 = vector.broadcast %cst_8 : f32 to vector<2x256xf32>
    %51 = arith.select %28, %49, %50 : vector<2x256xi1>, vector<2x256xf32>
    %52 = arith.addf %43, %51 : vector<2x256xf32>
    %53 = vector.broadcast %7 : f32 to vector<2x256xf32>
    %54 = arith.mulf %53, %3 : vector<2x256xf32>
    %55 = vector.broadcast %16 : f32 to vector<2x256xf32>
    %56 = arith.mulf %55, %4 : vector<2x256xf32>
    %57 = arith.addf %54, %56 : vector<2x256xf32>
    %c15_i32_9 = arith.constant 15 : i32
    %58 = tpu.dynamic_rotate %57 by %c15_i32_9 dim 1 : vector<2x256xf32>, i32 -> vector<2x256xf32>
    %59 = arith.andi %28, %34 : vector<2x256xi1>
    %cst_10 = arith.constant 0.000000e+00 : f32
    %60 = vector.broadcast %cst_10 : f32 to vector<2x256xf32>
    %61 = arith.select %59, %58, %60 : vector<2x256xi1>, vector<2x256xf32>
    %62 = arith.addf %52, %61 : vector<2x256xf32>
    %63 = vector.broadcast %8 : f32 to vector<2x256xf32>
    %64 = arith.mulf %63, %3 : vector<2x256xf32>
    %65 = vector.broadcast %17 : f32 to vector<2x256xf32>
    %66 = arith.mulf %65, %4 : vector<2x256xf32>
    %67 = arith.addf %64, %66 : vector<2x256xf32>
    %c1_i32_11 = arith.constant 1 : i32
    %68 = tpu.dynamic_rotate %67 by %c1_i32_11 dim 1 : vector<2x256xf32>, i32 -> vector<2x256xf32>
    %cst_12 = arith.constant 0.000000e+00 : f32
    %69 = vector.broadcast %cst_12 : f32 to vector<2x256xf32>
    %70 = arith.select %30, %68, %69 : vector<2x256xi1>, vector<2x256xf32>
    %71 = arith.addf %62, %70 : vector<2x256xf32>
    %72 = vector.broadcast %9 : f32 to vector<2x256xf32>
    %73 = arith.mulf %72, %3 : vector<2x256xf32>
    %74 = vector.broadcast %18 : f32 to vector<2x256xf32>
    %75 = arith.mulf %74, %4 : vector<2x256xf32>
    %76 = arith.addf %73, %75 : vector<2x256xf32>
    %77 = arith.addf %71, %76 : vector<2x256xf32>
    %78 = vector.broadcast %10 : f32 to vector<2x256xf32>
    %79 = arith.mulf %78, %3 : vector<2x256xf32>
    %80 = vector.broadcast %19 : f32 to vector<2x256xf32>
    %81 = arith.mulf %80, %4 : vector<2x256xf32>
    %82 = arith.addf %79, %81 : vector<2x256xf32>
    %c255_i32 = arith.constant 255 : i32
    %83 = tpu.dynamic_rotate %82 by %c255_i32 dim 1 : vector<2x256xf32>, i32 -> vector<2x256xf32>
    %cst_13 = arith.constant 0.000000e+00 : f32
    %84 = vector.broadcast %cst_13 : f32 to vector<2x256xf32>
    %85 = arith.select %34, %83, %84 : vector<2x256xi1>, vector<2x256xf32>
    %86 = arith.addf %77, %85 : vector<2x256xf32>
    %87 = vector.broadcast %11 : f32 to vector<2x256xf32>
    %88 = arith.mulf %87, %3 : vector<2x256xf32>
    %89 = vector.broadcast %20 : f32 to vector<2x256xf32>
    %90 = arith.mulf %89, %4 : vector<2x256xf32>
    %91 = arith.addf %88, %90 : vector<2x256xf32>
    %c241_i32 = arith.constant 241 : i32
    %92 = tpu.dynamic_rotate %91 by %c241_i32 dim 1 : vector<2x256xf32>, i32 -> vector<2x256xf32>
    %93 = arith.andi %32, %30 : vector<2x256xi1>
    %cst_14 = arith.constant 0.000000e+00 : f32
    %94 = vector.broadcast %cst_14 : f32 to vector<2x256xf32>
    %95 = arith.select %93, %92, %94 : vector<2x256xi1>, vector<2x256xf32>
    %96 = arith.addf %86, %95 : vector<2x256xf32>
    %97 = vector.broadcast %12 : f32 to vector<2x256xf32>
    %98 = arith.mulf %97, %3 : vector<2x256xf32>
    %99 = vector.broadcast %21 : f32 to vector<2x256xf32>
    %100 = arith.mulf %99, %4 : vector<2x256xf32>
    %101 = arith.addf %98, %100 : vector<2x256xf32>
    %c240_i32_15 = arith.constant 240 : i32
    %102 = tpu.dynamic_rotate %101 by %c240_i32_15 dim 1 : vector<2x256xf32>, i32 -> vector<2x256xf32>
    %cst_16 = arith.constant 0.000000e+00 : f32
    %103 = vector.broadcast %cst_16 : f32 to vector<2x256xf32>
    %104 = arith.select %32, %102, %103 : vector<2x256xi1>, vector<2x256xf32>
    %105 = arith.addf %96, %104 : vector<2x256xf32>
    %106 = vector.broadcast %13 : f32 to vector<2x256xf32>
    %107 = arith.mulf %106, %3 : vector<2x256xf32>
    %108 = vector.broadcast %22 : f32 to vector<2x256xf32>
    %109 = arith.mulf %108, %4 : vector<2x256xf32>
    %110 = arith.addf %107, %109 : vector<2x256xf32>
    %c239_i32 = arith.constant 239 : i32
    %111 = tpu.dynamic_rotate %110 by %c239_i32 dim 1 : vector<2x256xf32>, i32 -> vector<2x256xf32>
    %112 = arith.andi %32, %34 : vector<2x256xi1>
    %cst_17 = arith.constant 0.000000e+00 : f32
    %113 = vector.broadcast %cst_17 : f32 to vector<2x256xf32>
    %114 = arith.select %112, %111, %113 : vector<2x256xi1>, vector<2x256xf32>
    %115 = arith.addf %105, %114 : vector<2x256xf32>
    %116 = vector.broadcast %23 : f32 to vector<2x256xf32>
    %117 = arith.addf %115, %116 : vector<2x256xf32>
    %118 = arith.negf %117 : vector<2x256xf32>
    %119 = math.exp %118 : vector<2x256xf32>
    %cst_18 = arith.constant 1.000000e+00 : f32
    %120 = vector.broadcast %cst_18 : f32 to vector<2x256xf32>
    %121 = arith.addf %120, %119 : vector<2x256xf32>
    %122 = arith.divf %120, %121 : vector<2x256xf32>
    %c0_19 = arith.constant 0 : index
    %c0_20 = arith.constant 0 : index
    %c0_21 = arith.constant 0 : index
    %123 = vector.load %arg2[%c0_19, %c0_20, %c0_21] : memref<2x4x256xf32, #tpu.memory_space<vmem>>, vector<2x4x256xf32>
    %124 = vector.shape_cast %122 : vector<2x256xf32> to vector<2x1x256xf32>
    %125 = vector.broadcast %124 : vector<2x1x256xf32> to vector<2x4x256xf32>
    %126 = arith.mulf %123, %125 : vector<2x4x256xf32>
    %c0_22 = arith.constant 0 : index
    %c0_23 = arith.constant 0 : index
    %c0_24 = arith.constant 0 : index
    %127 = vector.load %arg3[%c0_22, %c0_23, %c0_24] : memref<2x4x256xf32, #tpu.memory_space<vmem>>, vector<2x4x256xf32>
    tpu.vector_store %arg3[%c0_22, %c0_23, %c0_24], %126 {strides = array<i32>} : memref<2x4x256xf32, #tpu.memory_space<vmem>>, vector<2x4x256xf32>,
    return
  }
  func.func @transform_0(%arg0: i32) -> i32 {
    %c0_i32 = arith.constant 0 : i32
    %c0_i32_0 = arith.constant 0 : i32
    return %c0_i32 : i32
  }
  func.func @transform_1(%arg0: i32) -> (i32, i32, i32) {
    %c0_i32 = arith.constant 0 : i32
    %c0_i32_0 = arith.constant 0 : i32
    %c0_i32_1 = arith.constant 0 : i32
    return %arg0, %c0_i32, %c0_i32_0 : i32, i32, i32
  }
  func.func @transform_2(%arg0: i32) -> (i32, i32, i32) {
    %c0_i32 = arith.constant 0 : i32
    %c0_i32_0 = arith.constant 0 : i32
    %c0_i32_1 = arith.constant 0 : i32
    return %arg0, %c0_i32, %c0_i32_0 : i32, i32, i32
  }
}

</mosaic_0001>

<bundles_post_ra>
// kernel: tpu_custom_call.1
= control target key start
LH: loop header
LB: loop body
LE: loop exit
PB: predicated region body
PF: predicated region fallthrough
CT: control target
= control target key end

     0   :  { %7 = vsyncpa [#allocation5], 0  ;;  %s950_s0 = inlined_call_operand.hbm [shape: f32[19], index: 0, kind: input, shape index: {}]   ;;  %s951_s1 = inlined_call_operand.hbm [shape: f32[2,4,256], index: 1, kind: input, shape index: {}]   ;;  %s952_s2 = inlined_call_operand.hbm [shape: f32[2,4,256], index: 2, kind: output, shape index: {}]  }
   0x1   :  { %8 = vsyncpa [#allocation3], 0 }
   0x2   :  { %9 = vsyncpa [#allocation4], 0  ;;  %s15_s11 = sshll.u32 %s950_s0, 4  ;;  %s23_s14 = sshll.u32 %s951_s1, 4  ;;  %s16_s11 = int_to_ptr.hbm [resolvable:$true] %s15_s11  ;;  %s24_s14 = int_to_ptr.hbm [resolvable:$true] %s23_s14 }
   0x3   :  { %s644_s15 = smov [#allocation2]   ;;  %s645_s16 = smov [#allocation6]  }
   0x4   :  { %18 = dma.hbm_to_smem %s16_s11, 16, %s644_s15, [#allocation5]  }
   0x5   :  { %s25_s17 = sshll.u32 %s645_s16, 4  ;;  %s646_s18 = smov 128   ;;  %s26_s17 = int_to_ptr.vmem [resolvable:$true] %s25_s17 }
   0x6   :  { %s647_s19 = smov 8  }
   0x7   :  { %31 = dma.hbm_to_vmem [thread:$0]  %s24_s14, 256, %s26_s17, [#allocation3], %s646_s18, %s646_s18, %s647_s19  }
   0x8   :  { %638 = dma.done.wait [#allocation5], 16  }
   0x9   :  { %639 = vsyncadd [#allocation5], 4294967280 }
   0xa   :  { %640 = dma.done.wait [#allocation3], 256  }
   0xb   :  { %641 = vsyncadd [#allocation3], 4294967040 }
   0xc   :  { %40 = sfence }
   0xd   :  { %v681_v0 = vld [vmem:[#allocation6] sm:$0xff]  ;;  %v683_v1 = vld [vmem:[#allocation6 + $0x8] sm:$0xff]  ;;  %vm56_vm0 = vcmask 1043456   ;;  %s693_s0 = sld [smem:[#allocation2 + $0x1]]  ;;  %vm178_vm1 = vcmask 1041409   ;;  %s648_s30 = smov 16  }
   0xe   :  { %45 = vst [vmem:[#allocation1] ss:$2 sm:$0xff] %v681_v0  ;;  %s695_s1 = sld [smem:[#allocation2 + $0xa]]  ;;  %s649_s3 = smov 17  }
   0xf   :  { %49 = vst [vmem:[#allocation1 + $0x10] ss:$2 sm:$0xff] %v683_v1  ;;  %s697_s20 = sld [smem:[#allocation2]]  ;;  %s650_s5 = smov 15  }
  0x10   :  { %s699_s21 = sld [smem:[#allocation2 + $0x9]]  ;;  %s651_s7 = smov 1  }
  0x11   :  { %s701_s22 = sld [smem:[#allocation2 + $0x3]]  ;;  %s652_s10 = smov 127  }
  0x12   :  { %s706_s23 = sld [smem:[#allocation2 + $0xc]]  ;;  %s653_s11 = smov 113  }
  0x13   :  { %v194_v47 = vstv %s693_s0  ;;  %s717_s24 = sld [smem:[#allocation2 + $0x2]]  ;;  %s654_s12 = smov 112  }
  0x14   :  { %v199_v52 = vstv %s695_s1  ;;  %s731_s25 = sld [smem:[#allocation2 + $0xb]]  ;;  %s655_s13 = smov 111  }
  0x15   :  { %v46_v2 = vld.sshfl [vmem:[#allocation1] sm:$0xff pattern:$0x75316420]  ;;  %v47_v3 = vld.sshfl [vmem:[#allocation1 + $0x8] sm:$0xff pattern:$0x75316420]  ;;  %v160_v56 = vstv %s697_s20 }
  0x16   :  { %v50_v4 = vld.sshfl [vmem:[#allocation1 + $0x10] sm:$0xff pattern:$0x75316420]  ;;  %v51_v5 = vld.sshfl [vmem:[#allocation1 + $0x18] sm:$0xff pattern:$0x75316420]  ;;  %v165_v57 = vstv %s699_s21 }
  0x17   :  { %v57_v6 = vsel %vm56_vm0, %v46_v2, 0.0  ;;  %v71_v7 = vsel %vm56_vm0, %v50_v4, 0.0  ;;  %89 = vst [vmem:[#allocation1] ss:$2 sm:$0xff] %v681_v0  ;;  %v64_v8 = vsel %vm56_vm0, %v47_v3, 0.0  ;;  %v78_v9 = vsel %vm56_vm0, %v51_v5, 0.0 }
  0x18   :  { %v58_v10 = vrot.slane %v57_v6, 4  ;;  %v72_v11 = vrot.slane %v71_v7, 4  ;;  %93 = vst [vmem:[#allocation1 + $0x10] ss:$2 sm:$0xff] %v683_v1  ;;  %v65_v12 = vrot.slane %v64_v8, 4  ;;  %v79_v13 = vrot.slane %v78_v9, 4 }
  0x19   :  { %v262_v2 = vstv %s701_s22  ;;  %v267_v3 = vstv %s706_s23  ;;  %s746_s26 = sld [smem:[#allocation2 + $0x6]]  ;;  %s656_s17 = smov [#allocation7]  }
  0x1a   :  { %v59_v14 = vadd.f32 %v58_v10, %v57_v6  ;;  %v73_v15 = vadd.f32 %v72_v11, %v71_v7  ;;  %v66_v16 = vadd.f32 %v65_v12, %v64_v8  ;;  %v80_v17 = vadd.f32 %v79_v13, %v78_v9  ;;  %s751_s27 = sld [smem:[#allocation2 + $0xf]]  ;;  %s521_s0 = sshll.u32 %s656_s17, 4  ;;  %s522_s0 = int_to_ptr.vmem [resolvable:$true] %s521_s0 }
  0x1b   :  { %s757_s28 = sld [smem:[#allocation2 + $0x5]]  ;;  %s523_s21 = sshll.u32 %s952_s2, 4  ;;  %s524_s21 = int_to_ptr.hbm [resolvable:$true] %s523_s21 }
  0x1c   :  { %v60_v18 = vrot.slane %v59_v14, 2  ;;  %v74_v19 = vrot.slane %v73_v15, 2  ;;  %v67_v20 = vrot.slane %v66_v16, 2  ;;  %v81_v21 = vrot.slane %v80_v17, 2  ;;  %s763_s29 = sld [smem:[#allocation2 + $0xe]] }
  0x1d   :  { %s783_s4 = sld [smem:[#allocation2 + $0x7]] }
  0x1e   :  { %v61_v22 = vadd.f32 %v60_v18, %v59_v14  ;;  %v75_v23 = vadd.f32 %v74_v19, %v73_v15  ;;  %v90_v24 = vld.sshfl [vmem:[#allocation1] sm:$0xff pattern:$0x75316420]  ;;  %v68_v25 = vadd.f32 %v67_v20, %v66_v16  ;;  %v82_v26 = vadd.f32 %v81_v21, %v80_v17  ;;  %v91_v27 = vld.sshfl [vmem:[#allocation1 + $0x8] sm:$0xff pattern:$0x75316420] }
  0x1f   :  { %v94_v28 = vld.sshfl [vmem:[#allocation1 + $0x10] sm:$0xff pattern:$0x75316420]  ;;  %v100_v29 = vsel %vm56_vm0, %v90_v24, -inf  ;;  %v107_v30 = vsel %vm56_vm0, %v91_v27, -inf  ;;  %v227_v27 = vstv %s717_s24  ;;  %s552_s6 = sld [smem:[#allocation2 + $0x10]] }
  0x20   :  { %v62_v31 = vrot.slane %v61_v22, 1  ;;  %v76_v32 = vrot.slane %v75_v23, 1  ;;  %v101_v33 = vrot.slane %v100_v29, 4  ;;  %v114_v34 = vsel %vm56_vm0, %v94_v28, -inf  ;;  %s544_s8 = sld [smem:[#allocation2 + $0x8]] }
  0x21   :  { %v115_v35 = vrot.slane %v114_v34, 4  ;;  %v69_v36 = vrot.slane %v68_v25, 1  ;;  %v83_v37 = vrot.slane %v82_v26, 1  ;;  %v95_v38 = vld.sshfl [vmem:[#allocation1 + $0x18] sm:$0xff pattern:$0x75316420] }
  0x22   :  { %v63_v39 = vadd.f32 %v62_v31, %v61_v22  ;;  %v77_v40 = vadd.f32 %v76_v32, %v75_v23  ;;  %v102_v41 = vmax.f32 %v100_v29, %v101_v33  ;;  %v108_v42 = vrot.slane %v107_v30, 4  ;;  %s553_s9 = sld [smem:[#allocation2 + $0x11]] }
  0x23   :  { %v116_v43 = vmax.f32 %v114_v34, %v115_v35  ;;  %v70_v44 = vadd.f32 %v69_v36, %v68_v25  ;;  %v121_v45 = vsel %vm56_vm0, %v95_v38, -inf  ;;  %v84_v48 = vadd.f32 %v83_v37, %v82_v26  ;;  %s540_s14 = sld [smem:[#allocation2 + $0x4]] }
  0x24   :  { %v103_v46 = vrot.slane %v102_v41, 2  ;;  %v109_v49 = vmax.f32 %v107_v30, %v108_v42  ;;  %v710_v50 = vmul.f32 0.25, %v63_v39  ;;  %v122_v53 = vrot.slane %v121_v45, 4  ;;  %s549_s15 = sld [smem:[#allocation2 + $0xd]] }
  0x25   :  { %v117_v51 = vrot.slane %v116_v43, 2  ;;  %v713_v54 = vmul.f32 0.25, %v77_v40  ;;  %v719_v59 = vmul.f32 0.25, %v70_v44  ;;  %v721_v63 = vmul.f32 0.25, %v84_v48  ;;  %s554_s16 = sld [smem:[#allocation2 + $0x12]] }
  0x26   :  { %v104_v55 = vmax.f32 %v102_v41, %v103_v46  ;;  %v110_v60 = vrot.slane %v109_v49, 2  ;;  %v123_v61 = vmax.f32 %v121_v45, %v122_v53  ;;  %v195_v5 = vmul.f32 %v194_v47, %v710_v50 }
  0x27   :  { %v118_v58 = vmax.f32 %v116_v43, %v117_v51  ;;  %v197_v9 = vmul.f32 %v194_v47, %v713_v54  ;;  %v161_v10 = vmul.f32 %v160_v56, %v710_v50  ;;  %v163_v11 = vmul.f32 %v160_v56, %v713_v54 }
  0x28   :  { %v105_v62 = vrot.slane %v104_v55, 1  ;;  %v111_v6 = vmax.f32 %v109_v49, %v110_v60  ;;  %v124_v7 = vrot.slane %v123_v61, 2  ;;  %v196_v15 = vmul.f32 %v194_v47, %v719_v59 }
  0x29   :  { %v119_v4 = vrot.slane %v118_v58, 1  ;;  %v198_v18 = vmul.f32 %v194_v47, %v721_v63  ;;  %v162_v19 = vmul.f32 %v160_v56, %v719_v59  ;;  %v164_v26 = vmul.f32 %v160_v56, %v721_v63 }
  0x2a   :  { %v726_v8 = vmax.f32 %v104_v55, %v105_v62  ;;  %v112_v13 = vrot.slane %v111_v6, 1  ;;  %v125_v14 = vmax.f32 %v123_v61, %v124_v7  ;;  %v264_v33 = vmul.f32 %v262_v2, %v719_v59 }
  0x2b   :  { %v733_v12 = vmax.f32 %v118_v58, %v119_v4  ;;  %v263_v34 = vmul.f32 %v262_v2, %v710_v50  ;;  %v265_v35 = vmul.f32 %v262_v2, %v713_v54  ;;  %v228_v42 = vmul.f32 %v227_v27, %v710_v50 }
  0x2c   :  { %v200_v16 = vmul.f32 %v199_v52, %v726_v8  ;;  %v166_v17 = vmul.f32 %v165_v57, %v726_v8  ;;  %v742_v22 = vmax.f32 %v111_v6, %v112_v13  ;;  %v126_v23 = vrot.slane %v125_v14, 1 }
  0x2d   :  { %v202_v20 = vmul.f32 %v199_v52, %v733_v12  ;;  %v168_v21 = vmul.f32 %v165_v57, %v733_v12  ;;  %v268_v39 = vmul.f32 %v267_v3, %v726_v8  ;;  %v270_v41 = vmul.f32 %v267_v3, %v733_v12 }
  0x2e   :  { %v204_v24 = vadd.f32 %v200_v16, %v195_v5  ;;  %v170_v25 = vadd.f32 %v166_v17, %v161_v10  ;;  %v748_v30 = vmax.f32 %v125_v14, %v126_v23  ;;  %v201_v31 = vmul.f32 %v199_v52, %v742_v22 }
  0x2f   :  { %v206_v28 = vadd.f32 %v202_v20, %v197_v9  ;;  %v172_v29 = vadd.f32 %v168_v21, %v163_v11  ;;  %v167_v32 = vmul.f32 %v165_v57, %v742_v22  ;;  %v232_v43 = vstv %s731_s25 }
  0x30   :  { %v203_v38 = vmul.f32 %v199_v52, %v748_v30  ;;  %v169_v40 = vmul.f32 %v165_v57, %v748_v30  ;;  %v205_v44 = vadd.f32 %v201_v31, %v196_v15  ;;  %v230_v47 = vmul.f32 %v227_v27, %v713_v54 }
  0x31   :  { %v212_v36 = vsel %vm178_vm1, %v206_v28, %v204_v24  ;;  %v179_v37 = vsel %vm178_vm1, %v172_v29, %v170_v25  ;;  %v171_v46 = vadd.f32 %v167_v32, %v162_v19  ;;  %v269_v49 = vmul.f32 %v267_v3, %v742_v22 }
  0x32   :  { %216 = vrot.lane.b32.xlu1 %v212_v36, %s648_s30  ;;  %183 = vrot.lane.b32.xlu0 %v179_v37, %s649_s3  ;;  %v207_v45 = vadd.f32 %v203_v38, %v198_v18  ;;  %v173_v48 = vadd.f32 %v169_v40, %v164_v26  ;;  %v233_v51 = vmul.f32 %v232_v43, %v726_v8  ;;  %v352_v58 = vstv %s746_s26 }
  0x33   :  { %v235_v52 = vmul.f32 %v232_v43, %v733_v12  ;;  %v266_v53 = vmul.f32 %v262_v2, %v721_v63  ;;  %v271_v55 = vmul.f32 %v267_v3, %v748_v30  ;;  %v272_v62 = vadd.f32 %v268_v39, %v263_v34 }
  0x34   :  { %v237_v56 = vadd.f32 %v233_v51, %v228_v42  ;;  %v213_v60 = vsel %vm178_vm1, %v207_v45, %v205_v44  ;;  %v180_v61 = vsel %vm178_vm1, %v173_v48, %v171_v46  ;;  %v274_v4 = vadd.f32 %v270_v41, %v265_v35 }
  0x35   :  { %v239_v57 = vadd.f32 %v235_v52, %v230_v47  ;;  %v273_v5 = vadd.f32 %v269_v49, %v264_v33  ;;  %v357_v7 = vstv %s751_s27  ;;  %v319_v9 = vstv %s757_s28 }
  0x36   :  { %v275_v2 = vadd.f32 %v271_v55, %v266_v53  ;;  %v353_v3 = vmul.f32 %v352_v58, %v710_v50  ;;  %v355_v10 = vmul.f32 %v352_v58, %v713_v54  ;;  %v324_v11 = vstv %s763_s29 }
  0x37   :  { %v245_v6 = vsel %vm178_vm1, %v239_v57, %v237_v56  ;;  %v229_v13 = vmul.f32 %v227_v27, %v719_v59  ;;  %v231_v14 = vmul.f32 %v227_v27, %v721_v63  ;;  %v234_v15 = vmul.f32 %v232_v43, %v742_v22 }
  0x38   :  { %249 = vrot.lane.b32.xlu2 %v245_v6, %s650_s5  ;;  %v358_v16 = vmul.f32 %v357_v7, %v726_v8  ;;  %v360_v17 = vmul.f32 %v357_v7, %v733_v12  ;;  %v321_v18 = vmul.f32 %v319_v9, %v719_v59  ;;  %v236_v19 = vmul.f32 %v232_v43, %v748_v30 }
  0x39   :  { %v323_v20 = vmul.f32 %v319_v9, %v721_v63  ;;  %v326_v21 = vmul.f32 %v324_v11, %v742_v22  ;;  %v328_v23 = vmul.f32 %v324_v11, %v748_v30  ;;  %v238_v24 = vadd.f32 %v234_v15, %v229_v13 }
  0x3a   :  { %218 = vrot.lane.b32.xlu1 %v213_v60, %s648_s30  ;;  %185 = vrot.lane.b32.xlu0 %v180_v61, %s649_s3  ;;  %v240_v25 = vadd.f32 %v236_v19, %v231_v14  ;;  %v280_v26 = vsel %vm178_vm1, %v274_v4, %v272_v62  ;;  %v281_v27 = vsel %vm178_vm1, %v275_v2, %v273_v5  ;;  %v387_v34 = vstv %s783_s4 }
  0x3b   :  { %v362_v28 = vadd.f32 %v358_v16, %v353_v3  ;;  %v364_v29 = vadd.f32 %v360_v17, %v355_v10  ;;  %v330_v32 = vadd.f32 %v326_v21, %v321_v18  ;;  %v332_v33 = vadd.f32 %v328_v23, %v323_v20 }
  0x3c   :  { %v246_v31 = vsel %vm178_vm1, %v240_v25, %v238_v24  ;;  %v392_v35 = vstv %s552_s6  ;;  %v320_v36 = vmul.f32 %v319_v9, %v710_v50  ;;  %v322_v37 = vmul.f32 %v319_v9, %v713_v54 }
  0x3d   :  { %v370_v38 = vsel %vm178_vm1, %v364_v29, %v362_v28  ;;  %v325_v39 = vmul.f32 %v324_v11, %v726_v8  ;;  %v327_v40 = vmul.f32 %v324_v11, %v733_v12  ;;  %v338_v41 = vsel %vm178_vm1, %v332_v33, %v330_v32 }
  0x3e   :  { %v389_v42 = vmul.f32 %v387_v34, %v719_v59  ;;  %v391_v43 = vmul.f32 %v387_v34, %v721_v63  ;;  %v394_v44 = vmul.f32 %v392_v35, %v742_v22  ;;  %v396_v45 = vmul.f32 %v392_v35, %v748_v30 }
  0x3f   :  { %v388_v46 = vmul.f32 %v387_v34, %v710_v50  ;;  %v329_v47 = vadd.f32 %v325_v39, %v320_v36  ;;  %v331_v48 = vadd.f32 %v327_v40, %v322_v37  ;;  %v354_v49 = vmul.f32 %v352_v58, %v719_v59 }
  0x40   :  { %251 = vrot.lane.b32.xlu2 %v246_v31, %s650_s5  ;;  %v356_v51 = vmul.f32 %v352_v58, %v721_v63  ;;  %v359_v52 = vmul.f32 %v357_v7, %v742_v22  ;;  %v361_v53 = vmul.f32 %v357_v7, %v748_v30  ;;  %v390_v55 = vmul.f32 %v387_v34, %v713_v54 }
  0x41   :  { %v393_v56 = vmul.f32 %v392_v35, %v726_v8  ;;  %v395_v57 = vmul.f32 %v392_v35, %v733_v12  ;;  %v337_v60 = vsel %vm178_vm1, %v331_v48, %v329_v47  ;;  %v420_v61 = vstv %s544_s8 }
  0x42   :  { %286 = vrot.lane.b32.xlu1 %v281_v27, %s651_s7  ;;  %284 = vrot.lane.b32.xlu0 %v280_v26, %s651_s7  ;;  %v363_v62 = vadd.f32 %v359_v52, %v354_v49  ;;  %v365_v58 = vadd.f32 %v361_v53, %v356_v51  ;;  %v398_v4 = vadd.f32 %v394_v44, %v389_v42  ;;  %v425_v9 = vstv %s553_s9 }
  0x43   :  { %v400_v5 = vadd.f32 %v396_v45, %v391_v43  ;;  %v397_v6 = vadd.f32 %v393_v56, %v388_v46  ;;  %v399_v7 = vadd.f32 %v395_v57, %v390_v55  ;;  %v422_v2 = vmul.f32 %v420_v61, %v719_v59 }
  0x44   :  { %v424_v3 = vmul.f32 %v420_v61, %v721_v63  ;;  %v421_v10 = vmul.f32 %v420_v61, %v710_v50  ;;  %v371_v11 = vsel %vm178_vm1, %v365_v58, %v363_v62  ;;  %v423_v13 = vmul.f32 %v420_v61, %v713_v54 }
  0x45   :  { %v426_v14 = vmul.f32 %v425_v9, %v726_v8  ;;  %v428_v15 = vmul.f32 %v425_v9, %v733_v12  ;;  %v406_v16 = vsel %vm178_vm1, %v400_v5, %v398_v4  ;;  %v405_v17 = vsel %vm178_vm1, %v399_v7, %v397_v6 }
  0x46   :  { %v427_v18 = vmul.f32 %v425_v9, %v742_v22  ;;  %v429_v19 = vmul.f32 %v425_v9, %v748_v30  ;;  %v147_v29 = vlaneseq  ;;  %v295_v42 = vstv %s540_s14 }
  0x47   :  { %v430_v20 = vadd.f32 %v426_v14, %v421_v10  ;;  %v432_v21 = vadd.f32 %v428_v15, %v423_v13  ;;  %v300_v43 = vstv %s549_s15  ;;  %v296_v51 = vmul.f32 %v295_v42, %v710_v50 }
  0x48   :  { %341 = vrot.lane.b32.xlu2 %v337_v60, %s652_s10  ;;  %v431_v23 = vadd.f32 %v427_v18, %v422_v2  ;;  %v433_v24 = vadd.f32 %v429_v19, %v424_v3  ;;  %v836_v32 = vand.u32 127, %v147_v29  ;;  %v297_v52 = vmul.f32 %v295_v42, %v719_v59 }
  0x49   :  { %v438_v25 = vsel %vm178_vm1, %v432_v21, %v430_v20  ;;  %v298_v53 = vmul.f32 %v295_v42, %v713_v54  ;;  %v301_v55 = vmul.f32 %v300_v43, %v726_v8  ;;  %v299_v50 = vmul.f32 %v295_v42, %v721_v63 }
  0x4a   :  { %374 = vrot.lane.b32.xlu1 %v370_v38, %s653_s11  ;;  %343 = vrot.lane.b32.xlu0 %v338_v41, %s652_s10  ;;  %v439_v26 = vsel %vm178_vm1, %v433_v24, %v431_v23  ;;  %v839_v35 = vadd.s32 128, %v836_v32  ;;  %v150_v36 = vand.u32 15, %v836_v32  ;;  %vm152_vm2 = vcmp.ge.s32.totalorder %v836_v32, 16 }
  0x4b   :  { %vm220_vm3 = vcmp.lt.s32.totalorder %v836_v32, 16  ;;  %vm187_vm5 = vcmp.lt.s32.totalorder %v836_v32, 17  ;;  %vm253_vm9 = vcmp.lt.s32.totalorder %v836_v32, 15  ;;  %vm288_vm10 = vcmp.lt.s32.totalorder %v836_v32, 1 }
  0x4c   :  { %v151_v38 = vand.u32 15, %v839_v35  ;;  %vm845_vm4 = vcmp.ge.s32.totalorder %v150_v36, 1  ;;  %vm864_vm8 = vcmp.lt.s32.totalorder %v150_v36, 15  ;;  %v302_v59 = vmul.f32 %v300_v43, %v742_v22 }
  0x4d   :  { %vm860_vm7 = vmand %vm152_vm2, %vm845_vm4  ;;  %v303_v54 = vmul.f32 %v300_v43, %v733_v12  ;;  %v304_v8 = vmul.f32 %v300_v43, %v748_v30  ;;  %v305_v9 = vadd.f32 %v301_v55, %v296_v51  ;;  %vm345_vm13 = vcmp.lt.s32.totalorder %v836_v32, 127 }
  0x4e   :  { %vm852_vm6 = vcmp.ge.s32.totalorder %v151_v38, 1  ;;  %vm886_vm11 = vcmp.lt.s32.totalorder %v151_v38, 15  ;;  %vm898_vm12 = vmand %vm152_vm2, %vm864_vm8  ;;  %v306_v3 = vadd.f32 %v302_v59, %v297_v52  ;;  %vm157_vm14 = vcmp.lt.s32.totalorder %v839_v35, 240 }
  0x4f   :  { %v307_v10 = vadd.f32 %v303_v54, %v298_v53  ;;  %vm378_vm15 = vcmp.lt.s32.totalorder %v836_v32, 113 }
  0x50   :  { %376 = vrot.lane.b32.xlu2 %v371_v11, %s653_s11  ;;  %v308_v11 = vadd.f32 %v304_v8, %v299_v50 }
  0x51   :  { %v313_v24 = vsel %vm178_vm1, %v307_v10, %v305_v9 }
  0x52   :  { %411 = vrot.lane.b32.xlu1 %v406_v16, %s654_s12  ;;  %409 = vrot.lane.b32.xlu0 %v405_v17, %s654_s12 }
  0x58   :  { %442 = vrot.lane.b32.xlu2 %v438_v25, %s655_s13  ;;  %v314_v25 = vsel %vm178_vm1, %v308_v11, %v306_v3 }
  0x5a   :  { %444 = vrot.lane.b32.xlu0 %v439_v26, %s655_s13 }
  0x92   :  { %v250_v31 = vpop.permute.xlu2 %249 }
  0x9a   :  { %v252_v37 = vpop.permute.xlu2 %251 }
  0x9b   :  { %v254_v4 = vsel %vm253_vm9, %v250_v31, %v252_v37  ;;  %v255_v5 = vsel %vm253_vm9, %v252_v37, %v250_v31 }
  0x9c   :  { %v258_v13 = vsel %vm898_vm12, %v255_v5, 0.0  ;;  %v259_v14 = vsel %vm886_vm11, %v254_v4, 0.0 }
  0xa2   :  { %v342_v62 = vpop.permute.xlu2 %341 }
  0xa4   :  { %v217_v27 = vpop.permute.xlu1 %216  ;;  %v184_v28 = vpop.permute.xlu0 %183 }
  0xaa   :  { %v377_v26 = vpop.permute.xlu2 %376 }
  0xac   :  { %v219_v33 = vpop.permute.xlu1 %218  ;;  %v186_v34 = vpop.permute.xlu0 %185 }
  0xad   :  { %v222_v44 = vsel %vm220_vm3, %v219_v33, %v217_v27  ;;  %v188_v47 = vsel %vm187_vm5, %v184_v28, %v186_v34  ;;  %v189_v48 = vsel %vm187_vm5, %v186_v34, %v184_v28  ;;  %v221_v56 = vsel %vm220_vm3, %v217_v27, %v219_v33  ;;  %vm382_vm3 = vmand %vm157_vm14, %vm852_vm6 }
  0xae   :  { %v223_v57 = vsel %vm152_vm2, %v222_v44, 0.0  ;;  %v192_v60 = vsel %vm860_vm7, %v189_v48, 0.0  ;;  %v193_v61 = vsel %vm852_vm6, %v188_v47, 0.0  ;;  %vm413_vm2 = vcmp.lt.s32.totalorder %v836_v32, 112 }
  0xaf   :  { %v225_v12 = vadd.f32 %v223_v57, %v192_v60  ;;  %v226_v22 = vadd.f32 %v221_v56, %v193_v61  ;;  %vm446_vm5 = vcmp.lt.s32.totalorder %v836_v32, 111  ;;  %v455_v56 = vstv %s554_s16 }
  0xb1   :  { %v260_v17 = vadd.f32 %v258_v13, %v225_v12  ;;  %v261_v18 = vadd.f32 %v259_v14, %v226_v22 }
  0xb2   :  { %v443_v47 = vpop.permute.xlu2 %442 }
  0xb4   :  { %v287_v40 = vpop.permute.xlu1 %286  ;;  %v285_v41 = vpop.permute.xlu0 %284 }
  0xb5   :  { %v289_v30 = vsel %vm288_vm10, %v285_v41, %v287_v40  ;;  %v290_v6 = vsel %vm288_vm10, %v287_v40, %v285_v41 }
  0xb6   :  { %v291_v15 = vsel %vm845_vm4, %v290_v6, 0.0  ;;  %v292_v16 = vsel %vm852_vm6, %v289_v30, 0.0  ;;  %vm450_vm6 = vmand %vm157_vm14, %vm886_vm11 }
  0xb7   :  { %v293_v19 = vadd.f32 %v291_v15, %v260_v17  ;;  %v294_v20 = vadd.f32 %v292_v16, %v261_v18 }
  0xb9   :  { %v317_v33 = vadd.f32 %v313_v24, %v293_v19  ;;  %v318_v34 = vadd.f32 %v314_v25, %v294_v20 }
  0xbc   :  { %v375_v7 = vpop.permute.xlu1 %374  ;;  %v344_v2 = vpop.permute.xlu0 %343 }
  0xbd   :  { %v346_v21 = vsel %vm345_vm13, %v342_v62, %v344_v2  ;;  %v347_v23 = vsel %vm345_vm13, %v344_v2, %v342_v62  ;;  %v379_v36 = vsel %vm378_vm15, %v375_v7, %v377_v26  ;;  %v380_v37 = vsel %vm378_vm15, %v377_v26, %v375_v7 }
  0xbe   :  { %v348_v27 = vsel %vm864_vm8, %v346_v21, 0.0  ;;  %v349_v28 = vsel %vm886_vm11, %v347_v23, 0.0  ;;  %v383_v42 = vsel %vm845_vm4, %v379_v36, 0.0  ;;  %v384_v43 = vsel %vm382_vm3, %v380_v37, 0.0 }
  0xbf   :  { %v350_v38 = vadd.f32 %v348_v27, %v317_v33  ;;  %v351_v40 = vadd.f32 %v349_v28, %v318_v34  ;;  %vm499_vm13 = vcmask 1040384  }
  0xc1   :  { %v385_v45 = vadd.f32 %v383_v42, %v350_v38  ;;  %v386_v48 = vadd.f32 %v384_v43, %v351_v40 }
  0xc4   :  { %v412_v29 = vpop.permute.xlu1 %411  ;;  %v410_v31 = vpop.permute.xlu0 %409 }
  0xc5   :  { %v415_v41 = vsel %vm413_vm2, %v412_v29, %v410_v31  ;;  %v414_v44 = vsel %vm413_vm2, %v410_v31, %v412_v29 }
  0xc6   :  { %v417_v46 = vsel %vm157_vm14, %v415_v41, 0.0  ;;  %v418_v52 = vadd.f32 %v414_v44, %v385_v45 }
  0xc7   :  { %v419_v53 = vadd.f32 %v417_v46, %v386_v48 }
  0xcc   :  { %v445_v51 = vpop.permute.xlu0 %444 }
  0xcd   :  { %v447_v39 = vsel %vm446_vm5, %v443_v47, %v445_v51  ;;  %v448_v55 = vsel %vm446_vm5, %v445_v51, %v443_v47 }
  0xce   :  { %v451_v57 = vsel %vm864_vm8, %v447_v39, 0.0  ;;  %v452_v60 = vsel %vm450_vm6, %v448_v55, 0.0 }
  0xcf   :  { %v453_v61 = vadd.f32 %v451_v57, %v418_v52  ;;  %v454_v62 = vadd.f32 %v452_v60, %v419_v53 }
  0xd1   :  { %v456_v32 = vadd.f32 %v455_v56, %v453_v61  ;;  %v457_v50 = vadd.f32 %v455_v56, %v454_v62 }
  0xd3   :  { %v555_v59 = vmul.f32 -1.442695, %v456_v32  ;;  %v556_v54 = vmul.f32 -1.442695, %v457_v50 }
  0xd5   :  { %570 = vpow2.f32 %v555_v59 }
  0xd6   :  { %572 = vpow2.f32 %v556_v54 }
  0xdb   :  { %v571_v35 = vpop.eup %570 }
  0xdc   :  { %v573_v8 = vpop.eup %572  ;;  %v464_v58 = vadd.f32 1.0, %v571_v35 }
  0xdd   :  { %v465_v4 = vadd.f32 1.0, %v573_v8 }
  0xde   :  { %574 = vrcp.f32 %v464_v58  ;;  %vm471_vm8 = vweird.f32 %v464_v58  ;;  %v477_v10 = vand.u32 2147483648, %v464_v58  ;;  %v475_v11 = vand.u32 2147483647, %v464_v58 }
  0xdf   :  { %576 = vrcp.f32 %v465_v4  ;;  %v492_v7 = vand.u32 2147483648, %v465_v4  ;;  %v490_v2 = vand.u32 2147483647, %v465_v4  ;;  %vm486_vm10 = vweird.f32 %v465_v4 }
  0xe0   :  { %v478_v17 = vor.u32 1.1754944e-38, %v477_v10  ;;  %vm476_vm14 = vcmp.eq.f32.partialorder %v475_v11, 8.507059e+37 }
  0xe1   :  { %v493_v14 = vor.u32 1.1754944e-38, %v492_v7  ;;  %vm491_vm12 = vcmp.eq.f32.partialorder %v490_v2, 8.507059e+37 }
  0xe4   :  { %v575_v5 = vpop.eup %574 }
  0xe5   :  { %v577_v63 = vpop.eup %576  ;;  %v467_v12 = vmul.f32 %v575_v5, %v464_v58  ;;  %vm472_vm4 = vweird.f32 %v575_v5 }
  0xe6   :  { %v482_v49 = vmul.f32 %v577_v63, %v465_v4  ;;  %vm487_vm7 = vweird.f32 %v577_v63  ;;  %vm473_vm9 = vmor %vm471_vm8, %vm472_vm4 }
  0xe7   :  { %v468_v22 = vsub.f32 1.0, %v467_v12  ;;  %vm488_vm11 = vmor %vm486_vm10, %vm487_vm7 }
  0xe8   :  { %v483_v30 = vsub.f32 1.0, %v482_v49 }
  0xe9   :  { %v469_v6 = vmul.f32 %v575_v5, %v468_v22 }
  0xea   :  { %v484_v9 = vmul.f32 %v577_v63, %v483_v30 }
  0xeb   :  { %v470_v3 = vadd.f32 %v575_v5, %v469_v6 }
  0xec   :  { %v485_v13 = vadd.f32 %v577_v63, %v484_v9 }
  0xed   :  { %v474_v15 = vsel %vm473_vm9, %v575_v5, %v470_v3 }
  0xee   :  { %v489_v16 = vsel %vm488_vm11, %v577_v63, %v485_v13  ;;  %v479_v20 = vsel %vm476_vm14, %v478_v17, %v474_v15 }
  0xef   :  { %v494_v18 = vsel %vm491_vm12, %v493_v14, %v489_v16 }
  0xf0   :  { %v498_v19 = vrot.slane %v494_v18, 7 }
  0xf2   :  { %v500_v21 = vsel %vm499_vm13, %v479_v20, %v498_v19  ;;  %v501_v23 = vsel %vm178_vm1, %v479_v20, %v498_v19 }
  0xf3   :  { %v502_v24 = vrot.slane %v501_v23, 1  ;;  %v504_v25 = vperm.slane %v500_v21, 1  ;;  %v503_v26 = vperm.slane %v500_v21, 0 }
  0xf5   :  { %v506_v27 = vperm.slane %v502_v24, 1  ;;  %v507_v28 = vrot.slane %v504_v25, 4  ;;  %v505_v29 = vperm.slane %v502_v24, 0 }
  0xf7   :  { %v508_v31 = vrot.slane %v506_v27, 4  ;;  %v509_v33 = vsel %vm56_vm0, %v503_v26, %v507_v28 }
  0xf8   :  { %v513_v34 = vmul.f32 %v509_v33, %v681_v0 }
  0xf9   :  { %v510_v36 = vsel %vm56_vm0, %v505_v29, %v508_v31 }
  0xfa   :  { %v514_v37 = vmul.f32 %v510_v36, %v683_v1  ;;  %515 = vst [vmem:[#allocation7] sm:$0xff] %v513_v34 }
  0xfc   :  { %516 = vst [vmem:[#allocation7 + $0x8] sm:$0xff] %v514_v37 }
  0xfd   :  { %529 = dma.vmem_to_hbm [thread:$0]  %s522_s0, 256, %s524_s21, [#allocation4], %s646_s18, %s646_s18, %s647_s19  }
  0xfe   :  { %642 = dma.done.wait [#allocation4], 256  }
  0xff   :  { %643 = vsyncadd [#allocation4], 4294967040 }
 0x100   :  { %534 = vsyncpa [#allocation3], 1 }
 0x101   :  { %535 = vsyncpa [#allocation4], 1 }
 0x102   :  { %536 = vsyncpa [#allocation5], 1 }

</bundles_post_ra>
